<compile_context>
chip_gen: v6e
topology: v6e:2x2x1
jax: 0.10.0
libtpu: 0.0.40
codegen_flags: <defaults>
</compile_context>

<pallas_src>
import jax
import jax.numpy as jnp
from jax.experimental import pallas as pl
from jax.experimental.pallas import tpu as pltpu

N_EMBED = 32
LANE = 128  # TPU lane width; packed rows are exactly one lane-row wide.


def _round_up(a, b):
    return (a + b - 1) // b * b


def _ff_kernel(x_ref, w_ref, b_ref, o_ref):
    # x_ref: (TM, 128) packed rows (4 logical rows of 32 per lane-row)
    # w_ref: (128, 128) block-diagonal (4 copies of W^T on the diagonal)
    # b_ref: (1, 128)   bias tiled 4x
    # o_ref: (TM, 128)
    y = jnp.dot(x_ref[...], w_ref[...], preferred_element_type=jnp.float32)
    y = y + b_ref[...]                      # f32 epilogue (v5e has no bf16 VPU)
    o_ref[...] = jnp.maximum(y, 0.0).astype(o_ref.dtype)


def prepare_params(weight, bias, lane=LANE):
    """One-time, parameter-load-time transform.

    PyTorch-convention weight (out, in) -> (in, out), then packed into a
    lane x lane block-diagonal matrix with `lane // C` copies of W^T so that
    a packed activation row (4 logical rows of width C laid out along the
    128 lanes) times this matrix yields the 4 independent matvecs.  The bias
    is tiled correspondingly to (1, lane).
    """
    c_out, c_in = weight.shape
    assert c_in == c_out and lane % c_in == 0, (
        "block-diagonal packing requires square W and lane % n_embed == 0")
    pack = lane // c_in
    wt = weight.T                                     # (in, out)
    w_bd = jnp.zeros((lane, lane), weight.dtype)
    for j in range(pack):                             # runs once at prep time
        w_bd = w_bd.at[j * c_in:(j + 1) * c_in,
                       j * c_out:(j + 1) * c_out].set(wt)
    b_p = jnp.tile(bias[None, :], (1, pack))          # (1, lane)
    return w_bd, b_p


def feed_forward(x, w_bd, b_packed, *, tm_max=2048):
    """x: (B, T, C). w_bd/b_packed come from prepare_params().

    tm_max is in *packed* rows (each packed row = lane//C logical rows).
    """
    B, T, C = x.shape
    lane = w_bd.shape[0]
    pack = lane // C
    M = B * T

    x2d = x.reshape(M, C)

    # Packed-row count and balanced tile selection.
    mp_raw = pl.cdiv(M, pack)
    ntiles = pl.cdiv(mp_raw, tm_max)
    # v7x has 2 TensorCores: give the "parallel" axis >=2 steps when there is
    # enough work (>= two minimal 8-sublane tiles). Harmless on v5e/v6e.
    if ntiles == 1 and mp_raw >= 16:
        ntiles = 2
    tm = _round_up(pl.cdiv(mp_raw, ntiles), 8)
    mp = ntiles * tm

    # Single wrapper-side pad (row axis only); the contraction dim keeps its
    # true width — no 4x-inflated copy of x ever touches HBM.
    pad_rows = mp * pack - M
    if pad_rows:
        x2d = jnp.pad(x2d, ((0, pad_rows), (0, 0)))
    xp = x2d.reshape(mp, lane)   # free, contiguous row-major reshape

    itemsize = jnp.dtype(x.dtype).itemsize
    cost = pl.CostEstimate(
        flops=2 * mp * lane * lane,
        transcendentals=0,
        bytes_accessed=(2 * mp * lane + lane * lane + lane) * itemsize,
    )

    out_p = pl.pallas_call(
        _ff_kernel,
        out_shape=jax.ShapeDtypeStruct((mp, lane), x.dtype),
        grid=(ntiles,),
        in_specs=[
            pl.BlockSpec((tm, lane), lambda i: (i, 0)),
            pl.BlockSpec((lane, lane), lambda i: (0, 0)),   # VMEM-resident
            pl.BlockSpec((1, lane), lambda i: (0, 0)),      # VMEM-resident
        ],
        out_specs=pl.BlockSpec((tm, lane), lambda i: (i, 0)),
        compiler_params=pltpu.CompilerParams(
            dimension_semantics=("parallel",),   # shard rows across TCs on v7x
        ),
        cost_estimate=cost,
    )(xp, w_bd, b_packed)

    # Padded rows hold max(bias, 0) (nonzero) — the [:M] slice removes them.
    return out_p.reshape(mp * pack, C)[:M].reshape(B, T, C)


def _reference(x, weight, bias):
    return jnp.maximum(jnp.einsum("btc,oc->bto", x, weight) + bias, 0.0)


if __name__ == "__main__":
    key = jax.random.PRNGKey(0)
    k_x, k_w, k_b = jax.random.split(key, 3)

    B, T, C = 2, 8, N_EMBED
    x = jax.random.normal(k_x, (B, T, C), dtype=jnp.float32)

    # PyTorch Linear shapes: weight (out, in), bias (out,)
    bound = 1.0 / jnp.sqrt(C)
    weight = jax.random.uniform(k_w, (C, C), minval=-bound, maxval=bound,
                                dtype=jnp.float32)
    bias = jax.random.uniform(k_b, (C,), minval=-bound, maxval=bound,
                              dtype=jnp.float32)

    # One-time parameter prep (transpose + block-diag pack), outside call path.
    w_prep, b_prep = prepare_params(weight, bias)

    ff = jax.jit(feed_forward)
    out = ff(x, w_prep, b_prep)
    jax.block_until_ready(out)

    ref = _reference(x, weight, bias)
    assert out.shape == (B, T, C)
    assert jnp.allclose(out, ref, atol=1e-5, rtol=1e-5), "mismatch vs reference"

    print("KERNEL_OK")
</pallas_src>

<mosaic_0001>
module attributes {stable_mosaic.version = 11 : i64} {
  func.func @_ff_kernel(%arg0: i32, %arg1: memref<8x128xf32, #tpu.memory_space<vmem>>, %arg2: memref<128x128xf32, #tpu.memory_space<vmem>>, %arg3: memref<1x128xf32, #tpu.memory_space<vmem>>, %arg4: memref<8x128xf32, #tpu.memory_space<vmem>>) attributes {dimension_semantics = [#tpu.dimension_semantics<parallel>], iteration_bounds = array<i64: 1>, scalar_prefetch = 0 : i64, scratch_operands = 0 : i64, tpu.core_type = #tpu.core_type<tc>, window_params = [{transform_indices = @transform_0, window_bounds = array<i64: 8, 128>}, {pipeline_mode = #tpu.pipeline_mode<synchronous>, transform_indices = @transform_1, window_bounds = array<i64: 128, 128>}, {pipeline_mode = #tpu.pipeline_mode<synchronous>, transform_indices = @transform_2, window_bounds = array<i64: 1, 128>}, {transform_indices = @transform_3, window_bounds = array<i64: 8, 128>}]} {
    %c0 = arith.constant 0 : index
    %c0_0 = arith.constant 0 : index
    %0 = vector.load %arg1[%c0, %c0_0] : memref<8x128xf32, #tpu.memory_space<vmem>>, vector<8x128xf32>
    %c0_1 = arith.constant 0 : index
    %c0_2 = arith.constant 0 : index
    %1 = vector.load %arg2[%c0_1, %c0_2] : memref<128x128xf32, #tpu.memory_space<vmem>>, vector<128x128xf32>
    %cst = arith.constant dense<0.000000e+00> : vector<8x128xf32>
    %2 = tpu.matmul %0, %1, %cst {dimension_numbers = #tpu.dot_dimension_numbers<[1], [0], [0], [1], [0, 0, 1, 1], [], []>} : vector<8x128xf32>, vector<128x128xf32>, vector<8x128xf32> -> vector<8x128xf32>
    %c0_3 = arith.constant 0 : index
    %c0_4 = arith.constant 0 : index
    %3 = vector.load %arg3[%c0_3, %c0_4] : memref<1x128xf32, #tpu.memory_space<vmem>>, vector<1x128xf32>
    %4 = vector.broadcast %3 : vector<1x128xf32> to vector<8x128xf32>
    %5 = arith.addf %2, %4 : vector<8x128xf32>
    %cst_5 = arith.constant 0.000000e+00 : f32
    %6 = vector.broadcast %cst_5 : f32 to vector<8x128xf32>
    %7 = arith.maximumf %5, %6 : vector<8x128xf32>
    %c0_6 = arith.constant 0 : index
    %c0_7 = arith.constant 0 : index
    %8 = vector.load %arg4[%c0_6, %c0_7] : memref<8x128xf32, #tpu.memory_space<vmem>>, vector<8x128xf32>
    tpu.vector_store %arg4[%c0_6, %c0_7], %7 {strides = array<i32>} : memref<8x128xf32, #tpu.memory_space<vmem>>, vector<8x128xf32>,
    return
  }
  func.func @transform_0(%arg0: i32) -> (i32, i32) {
    %c0_i32 = arith.constant 0 : i32
    %c0_i32_0 = arith.constant 0 : i32
    return %arg0, %c0_i32 : i32, i32
  }
  func.func @transform_1(%arg0: i32) -> (i32, i32) {
    %c0_i32 = arith.constant 0 : i32
    %c0_i32_0 = arith.constant 0 : i32
    %c0_i32_1 = arith.constant 0 : i32
    return %c0_i32, %c0_i32_0 : i32, i32
  }
  func.func @transform_2(%arg0: i32) -> (i32, i32) {
    %c0_i32 = arith.constant 0 : i32
    %c0_i32_0 = arith.constant 0 : i32
    %c0_i32_1 = arith.constant 0 : i32
    return %c0_i32, %c0_i32_0 : i32, i32
  }
  func.func @transform_3(%arg0: i32) -> (i32, i32) {
    %c0_i32 = arith.constant 0 : i32
    %c0_i32_0 = arith.constant 0 : i32
    return %arg0, %c0_i32 : i32, i32
  }
}

</mosaic_0001>

<bundles_post_ra>
// kernel: feed_forward.1
= control target key start
LH: loop header
LB: loop body
LE: loop exit
PB: predicated region body
PF: predicated region fallthrough
CT: control target
= control target key end

     0   :  { %8 = vsyncpa [#allocation3], 0  ;;  %s209_s12 = smov [#allocation2]   ;;  %s246_s0 = inlined_call_operand.vmem [shape: f32[8,128], index: 0, kind: input, shape index: {}]   ;;  %s247_s1 = inlined_call_operand.hbm [shape: f32[128,128], index: 1, kind: input, shape index: {}]   ;;  %s248_s2 = inlined_call_operand.vmem [shape: f32[1,128], index: 2, kind: input, shape index: {}]   ;;  %s249_s3 = inlined_call_operand.vmem [shape: f32[8,128], index: 3, kind: output, shape index: {}]  }
   0x1   :  { %s16_s13 = sshll.u32 %s209_s12, 4  ;;  %s17_s13 = int_to_ptr.vmem [resolvable:$true] %s16_s13 }
   0x2   :  { %s195_s14 = scalar_lea.vmem %s17_s13, 2048  ;;  %p200_p1 = scmp.lt.s32.totalorder %s17_s13, %s17_s13 }
   0x3   :  { %p196_p0 = scmp.ne.s32.totalorder %s17_s13, %s195_s14  ;;  %p201_p2 = scmp.lt.s32.totalorder %s195_s14, %s195_s14 }
   0x5   :  { %p202_p3 = por %p201_p2, %p200_p1 }
   0x7   :  { %p203_p4 = pnand %p202_p3, %p196_p0 }
   0x9   :  { %206 = shalt.err (!%p203_p4)
}
   0xa   :  { %s210_s15 = smov 128   ;;  %s211_s16 = smov 8  }
   0xb   :  { %22 = dma.hbm_to_vmem [thread:$0]  %s247_s1, 2048, %s17_s13, [#allocation3], %s210_s15, %s210_s15, %s211_s16  }
   0xc   :  { %207 = dma.done.wait [#allocation3], 2048  }
   0xd   :  { %208 = vsyncadd [#allocation3], 4294965248  ;;  %v212_v0 = vmov 0.0   ;;  %vm213_vm0 = vmmov 0   ;;  %v44_v1 = vld [vmem:[#allocation2 + $0x78] sm:$0xff]  ;;  %v43_v2 = vld [vmem:[#allocation2 + $0x70] sm:$0xff] }
   0xe   :  { %147 = vmatprep.subr.mxu0 %v212_v0  ;;  %179 = vmatprep.mubr.msk.f32.mxu0 %vm213_vm0, %v212_v0  ;;  %v42_v3 = vld [vmem:[#allocation2 + $0x68] sm:$0xff]  ;;  %v41_v4 = vld [vmem:[#allocation2 + $0x60] sm:$0xff]  ;;  %v40_v5 = vld [vmem:[#allocation2 + $0x58] sm:$0xff] }
   0xf   :  { %148 = vmatpush3.msra.mxu0 %v44_v1  ;;  %v39_v6 = vld [vmem:[#allocation2 + $0x50] sm:$0xff]  ;;  %v38_v7 = vld [vmem:[#allocation2 + $0x48] sm:$0xff]  ;;  %v37_v8 = vld [vmem:[#allocation2 + $0x40] sm:$0xff] }
  0x10   :  { %149 = vmatprep.subr.mxu0 %v212_v0  ;;  %v36_v9 = vld [vmem:[#allocation2 + $0x38] sm:$0xff]  ;;  %v35_v10 = vld [vmem:[#allocation2 + $0x30] sm:$0xff]  ;;  %v34_v11 = vld [vmem:[#allocation2 + $0x28] sm:$0xff] }
  0x11   :  { %150 = vmatpush3.msra.mxu0 %v43_v2  ;;  %v33_v12 = vld [vmem:[#allocation2 + $0x20] sm:$0xff]  ;;  %v32_v13 = vld [vmem:[#allocation2 + $0x18] sm:$0xff]  ;;  %v31_v14 = vld [vmem:[#allocation2 + $0x10] sm:$0xff] }
  0x12   :  { %151 = vmatprep.subr.mxu0 %v212_v0  ;;  %v30_v15 = vld [vmem:[#allocation2 + $0x8] sm:$0xff]  ;;  %v29_v16 = vld [vmem:[#allocation2] sm:$0xff] }
  0x13   :  { %152 = vmatpush3.msra.mxu0 %v42_v3  ;;  %v28_v17 = vld [vmem:[%s246_s0] sm:$0xff] }
  0x14   :  { %153 = vmatprep.subr.mxu0 %v212_v0  ;;  %v129_v18 = vld [vmem:[%s248_s2] ss:$0 sm:$0xff] }
  0x15   :  { %154 = vmatpush3.msra.mxu0 %v41_v4 }
  0x16   :  { %155 = vmatprep.subr.mxu0 %v212_v0 }
  0x17   :  { %156 = vmatpush3.msra.mxu0 %v40_v5 }
  0x18   :  { %157 = vmatprep.subr.mxu0 %v212_v0 }
  0x19   :  { %158 = vmatpush3.msra.mxu0 %v39_v6 }
  0x1a   :  { %159 = vmatprep.subr.mxu0 %v212_v0 }
  0x1b   :  { %160 = vmatpush3.msra.mxu0 %v38_v7 }
  0x1c   :  { %161 = vmatprep.subr.mxu0 %v212_v0 }
  0x1d   :  { %162 = vmatpush3.msra.mxu0 %v37_v8 }
  0x1e   :  { %163 = vmatprep.subr.mxu0 %v212_v0 }
  0x1f   :  { %164 = vmatpush3.msra.mxu0 %v36_v9 }
  0x20   :  { %165 = vmatprep.subr.mxu0 %v212_v0 }
  0x21   :  { %166 = vmatpush3.msra.mxu0 %v35_v10 }
  0x22   :  { %167 = vmatprep.subr.mxu0 %v212_v0 }
  0x23   :  { %168 = vmatpush3.msra.mxu0 %v34_v11 }
  0x24   :  { %169 = vmatprep.subr.mxu0 %v212_v0 }
  0x25   :  { %170 = vmatpush3.msra.mxu0 %v33_v12 }
  0x26   :  { %171 = vmatprep.subr.mxu0 %v212_v0 }
  0x27   :  { %172 = vmatpush3.msra.mxu0 %v32_v13 }
  0x28   :  { %173 = vmatprep.subr.mxu0 %v212_v0 }
  0x29   :  { %174 = vmatpush3.msra.mxu0 %v31_v14 }
  0x2a   :  { %175 = vmatprep.subr.mxu0 %v212_v0 }
  0x2b   :  { %176 = vmatpush3.msra.mxu0 %v30_v15 }
  0x2c   :  { %177 = vmatprep.subr.mxu0 %v212_v0 }
  0x2d   :  { %178 = vmatpush3.msra.mxu0 %v29_v16 }
  0x2e   :  { %180 = vmatmul.mubr.f32.vlgmr.msra.gmra.mxu0 %v28_v17 }
  0xee   :  { %v118_v19 = vpop.f32.mrf.mxu0 }
  0xef   :  { %v119_v20 = vadd.f32 %v129_v18, %v118_v19 }
  0xf0   :  { %v181_v21 = vpop.f32.mrf.mxu0 }
  0xf1   :  { %v122_v22 = vmax.f32 %v119_v20, 0.0 }
  0xf3   :  { %123 = vst [vmem:[%s249_s3] sm:$0xff] %v122_v22 }
  0xf4   :  { %128 = vsyncpa [#allocation3], 1 }

</bundles_post_ra>
